<compile_context>
chip_gen: v7x
topology: tpu7x:2x2x1
jax: 0.10.0
libtpu: 0.0.40
codegen_flags: <defaults>
</compile_context>

<pallas_src>
import functools

import jax
import jax.numpy as jnp
from jax.experimental import pallas as pl
from jax.experimental.pallas import tpu as pltpu

_SUB = 8     # f32 sublane tile
_LANE = 128  # lane tile


def _mycell_kernel(x_ref, h_ref, wt_ref, b_ref, o_ref, *, batch):
    # All refs are lane-dense padded VMEM tiles:
    #   x_ref, h_ref, o_ref : (8, 128)    real data in [:batch, :4]
    #   wt_ref              : (128, 128)  W^T, real data in [:4, :4], rest zero
    #   b_ref               : (1, 128)    bias, zero beyond col 4
    x = x_ref[...]
    h = h_ref[...]
    wt = wt_ref[...]
    b = b_ref[...]

    # linear: y = x @ W^T + b on aligned (8,128)x(128,128) f32 tiles.
    # Padded lanes of W^T / bias are zero, so padded output lanes stay zero.
    y = jnp.dot(x, wt, preferred_element_type=jnp.float32) + b

    # MyDecisionGate: y if y.sum() > 0 else -y, where the sum is over the real
    # (batch, 4) region only.  Padded lanes are already zero; mask the padded
    # sublane rows (they carry the broadcast bias) before reducing.
    row_ids = jax.lax.broadcasted_iota(jnp.int32, y.shape, 0)
    s = jnp.sum(jnp.where(row_ids < batch, y, 0.0))

    # Scalar-sign form avoids materializing -y.
    sign = jnp.where(s > 0.0, 1.0, -1.0).astype(jnp.float32)
    g = y * sign

    # new_h = tanh(g + h); full-width lane-dense (unmasked) store.
    o_ref[...] = jnp.tanh(g + h).astype(o_ref.dtype)


@jax.jit
def mycell_forward(x, h, weight, bias):
    """Fused MyCell forward.  Returns (new_h, new_h).

    x, h   : (B, F) f32
    weight : (F_out, F_in) f32 (PyTorch nn.Linear layout)
    bias   : (F_out,) f32
    """
    B, F = x.shape
    Fo, Fi = weight.shape

    Bp = max(_SUB, ((B + _SUB - 1) // _SUB) * _SUB)
    Fp = max(_LANE, ((F + _LANE - 1) // _LANE) * _LANE)
    Fip = max(_LANE, ((Fi + _LANE - 1) // _LANE) * _LANE)

    # Wrapper-side layout work (done once, fused by XLA):
    #  - pre-transpose W to (in, out) so the kernel does no transpose,
    #  - zero-pad everything to lane-dense (8,128)-aligned f32 tiles.
    x_pad = jnp.zeros((Bp, Fip), x.dtype).at[:B, :Fi].set(x)
    h_pad = jnp.zeros((Bp, Fp), h.dtype).at[:B, :F].set(h)
    wt_pad = jnp.zeros((Fip, Fp), weight.dtype).at[:Fi, :Fo].set(weight.T)
    b_pad = jnp.zeros((1, Fp), bias.dtype).at[0, :Fo].set(bias)

    out_pad = pl.pallas_call(
        functools.partial(_mycell_kernel, batch=B),
        out_shape=jax.ShapeDtypeStruct((Bp, Fp), x.dtype),
        in_specs=[
            pl.BlockSpec(memory_space=pltpu.VMEM),  # x  (Bp, Fip)
            pl.BlockSpec(memory_space=pltpu.VMEM),  # h  (Bp, Fp)
            pl.BlockSpec(memory_space=pltpu.VMEM),  # W^T (Fip, Fp)
            pl.BlockSpec(memory_space=pltpu.VMEM),  # bias (1, Fp)
        ],
        out_specs=pl.BlockSpec(memory_space=pltpu.VMEM),
        # h_pad is a same-shape/dtype wrapper temp: alias it to the output so
        # no extra HBM output buffer is allocated.
        input_output_aliases={1: 0},
    )(x_pad, h_pad, wt_pad, b_pad)

    new_h = out_pad[:B, :F]
    return new_h, new_h


if __name__ == "__main__":
    key = jax.random.PRNGKey(0)
    kx, kh, kw, kb = jax.random.split(key, 4)

    # Shapes implied by the module: x, h ~ (3, 4); Linear(4, 4).
    x = jax.random.uniform(kx, (3, 4), dtype=jnp.float32)
    h = jax.random.uniform(kh, (3, 4), dtype=jnp.float32)

    # Deterministic nn.Linear(4, 4)-style init: U(-1/sqrt(4), 1/sqrt(4)).
    bound = 1.0 / jnp.sqrt(4.0)
    weight = jax.random.uniform(kw, (4, 4), dtype=jnp.float32,
                                minval=-bound, maxval=bound)
    bias = jax.random.uniform(kb, (4,), dtype=jnp.float32,
                              minval=-bound, maxval=bound)

    new_h, new_h2 = mycell_forward(x, h, weight, bias)
    jax.block_until_ready(new_h)

    # Cross-check against a pure-JAX reference.
    y_ref = x @ weight.T + bias
    g_ref = jnp.where(jnp.sum(y_ref) > 0.0, y_ref, -y_ref)
    ref = jnp.tanh(g_ref + h)
    assert jnp.allclose(new_h, ref, atol=1e-5, rtol=1e-5), "mismatch vs reference"
    assert jnp.array_equal(new_h, new_h2)

    print("KERNEL_OK")
</pallas_src>

<mosaic_0001>
module attributes {stable_mosaic.version = 11 : i64} {
  func.func @_mycell_kernel(%arg0: memref<8x128xf32, #tpu.memory_space<vmem>>, %arg1: memref<8x128xf32, #tpu.memory_space<vmem>>, %arg2: memref<128x128xf32, #tpu.memory_space<vmem>>, %arg3: memref<1x128xf32, #tpu.memory_space<vmem>>, %arg4: memref<8x128xf32, #tpu.memory_space<vmem>>) attributes {dimension_semantics = [], scalar_prefetch = 0 : i64, scratch_operands = 0 : i64, tpu.core_type = #tpu.core_type<tc>} {
    %c0 = arith.constant 0 : index
    %c0_0 = arith.constant 0 : index
    %0 = vector.load %arg0[%c0, %c0_0] : memref<8x128xf32, #tpu.memory_space<vmem>>, vector<8x128xf32>
    %c0_1 = arith.constant 0 : index
    %c0_2 = arith.constant 0 : index
    %1 = vector.load %arg1[%c0_1, %c0_2] : memref<8x128xf32, #tpu.memory_space<vmem>>, vector<8x128xf32>
    %c0_3 = arith.constant 0 : index
    %c0_4 = arith.constant 0 : index
    %2 = vector.load %arg2[%c0_3, %c0_4] : memref<128x128xf32, #tpu.memory_space<vmem>>, vector<128x128xf32>
    %c0_5 = arith.constant 0 : index
    %c0_6 = arith.constant 0 : index
    %3 = vector.load %arg3[%c0_5, %c0_6] : memref<1x128xf32, #tpu.memory_space<vmem>>, vector<1x128xf32>
    %cst = arith.constant dense<0.000000e+00> : vector<8x128xf32>
    %4 = tpu.matmul %0, %2, %cst {dimension_numbers = #tpu.dot_dimension_numbers<[1], [0], [0], [1], [0, 0, 1, 1], [], []>} : vector<8x128xf32>, vector<128x128xf32>, vector<8x128xf32> -> vector<8x128xf32>
    %5 = vector.broadcast %3 : vector<1x128xf32> to vector<8x128xf32>
    %6 = arith.addf %4, %5 : vector<8x128xf32>
    %7 = tpu.iota {dimensions = array<i32: 0>} : vector<8x128xi32>
    %c3_i32 = arith.constant 3 : i32
    %8 = vector.broadcast %c3_i32 : i32 to vector<8x128xi32>
    %9 = arith.cmpi slt, %7, %8 : vector<8x128xi32>
    %cst_7 = arith.constant 0.000000e+00 : f32
    %10 = vector.broadcast %cst_7 : f32 to vector<8x128xf32>
    %11 = arith.select %9, %6, %10 : vector<8x128xi1>, vector<8x128xf32>
    %12 = vector.shape_cast %11 : vector<8x128xf32> to vector<1x8x128xf32>
    %cst_8 = arith.constant dense<0.000000e+00> : vector<1xf32>
    %13 = vector.multi_reduction <add>, %12, %cst_8 [1, 2] : vector<1x8x128xf32> to vector<1xf32>
    %14 = vector.shape_cast %13 : vector<1xf32> to vector<1x1x1xf32>
    %15 = vector.extract %14[0, 0, 0] : f32 from vector<1x1x1xf32>
    %cst_9 = arith.constant 0.000000e+00 : f32
    %16 = arith.cmpf ogt, %15, %cst_9 : f32
    %cst_10 = arith.constant 1.000000e+00 : f32
    %cst_11 = arith.constant -1.000000e+00 : f32
    %17 = arith.select %16, %cst_10, %cst_11 : f32
    %18 = vector.broadcast %17 : f32 to vector<8x128xf32>
    %19 = arith.mulf %6, %18 : vector<8x128xf32>
    %20 = arith.addf %19, %1 : vector<8x128xf32>
    %21 = math.tanh %20 : vector<8x128xf32>
    %c0_12 = arith.constant 0 : index
    %c0_13 = arith.constant 0 : index
    %22 = vector.load %arg4[%c0_12, %c0_13] : memref<8x128xf32, #tpu.memory_space<vmem>>, vector<8x128xf32>
    tpu.vector_store %arg4[%c0_12, %c0_13], %21 {strides = array<i32>} : memref<8x128xf32, #tpu.memory_space<vmem>>, vector<8x128xf32>,
    return
  }
}

</mosaic_0001>

<bundles_post_ra>
// kernel: mycell_forward.1
= control target key start
LH: loop header
LB: loop body
LE: loop exit
PB: predicated region body
PF: predicated region fallthrough
CT: control target
= control target key end

     0   :  { %v220_v0 = vmov 0.0|0.0   ;;  %vm221_vm0 = vmmov 0   ;;  %v222_v4 = vmov 0.0   ;;  %v112_v27 = vlaneseq  ;;  %s308_s2 = inlined_call_operand.vmem [shape: f32[128,128], index: 2, kind: input, shape index: {}]   ;;  %s309_s0 = inlined_call_operand.vmem [shape: f32[8,128], index: 0, kind: input, shape index: {}]   ;;  %s310_s3 = inlined_call_operand.vmem [shape: f32[1,128], index: 3, kind: input, shape index: {}]   ;;  %s311_s1 = inlined_call_operand.vmem [shape: f32[8,128], index: 1, kind: input, shape index: {}, may-alias: {1,4}]   ;;  %s312_s4 = inlined_call_operand.vmem [shape: f32[8,128], index: 4, kind: output, shape index: {}, may-alias: {1,4}]  }
   0x1   :  { %189 = vmatprep.subr.bf16.mxu0 %v220_v0  ;;  %v19_v1 = vld [vmem:[%s308_s2] sm:$0xff]  ;;  %v20_v2 = vld [vmem:[%s308_s2 + $0x8] sm:$0xff]  ;;  %v21_v3 = vld [vmem:[%s308_s2 + $0x10] sm:$0xff]  ;;  %186 = vmatprep.mubr.msk.f32.mxu0 %vm221_vm0, %v222_v4 }
   0x2   :  { %v190_v5 = vpack.c.bf16 %v20_v2, %v19_v1  ;;  %v22_v6 = vld [vmem:[%s308_s2 + $0x18] sm:$0xff]  ;;  %v23_v8 = vld [vmem:[%s308_s2 + $0x20] sm:$0xff]  ;;  %v24_v9 = vld [vmem:[%s308_s2 + $0x28] sm:$0xff]  ;;  %v113_v28 = vshrl.u32 %v112_v27, 7 }
   0x3   :  { %v193_v7 = vpack.c.bf16 %v22_v6, %v21_v3  ;;  %v196_v10 = vpack.c.bf16 %v24_v9, %v23_v8  ;;  %v25_v11 = vld [vmem:[%s308_s2 + $0x30] sm:$0xff]  ;;  %v26_v12 = vld [vmem:[%s308_s2 + $0x38] sm:$0xff]  ;;  %v27_v14 = vld [vmem:[%s308_s2 + $0x40] sm:$0xff] }
   0x4   :  { %191 = vmatpush3.bf16.msra.mxu0 %v190_v5  ;;  %v199_v13 = vpack.c.bf16 %v26_v12, %v25_v11  ;;  %v28_v15 = vld [vmem:[%s308_s2 + $0x48] sm:$0xff]  ;;  %v29_v17 = vld [vmem:[%s308_s2 + $0x50] sm:$0xff]  ;;  %v30_v18 = vld [vmem:[%s308_s2 + $0x58] sm:$0xff]  ;;  %vm114_vm1 = vcmp.lt.s32.totalorder %v113_v28, 3 }
   0x5   :  { %192 = vmatprep.subr.bf16.mxu0 %v220_v0  ;;  %v202_v16 = vpack.c.bf16 %v28_v15, %v27_v14  ;;  %v205_v19 = vpack.c.bf16 %v30_v18, %v29_v17  ;;  %v31_v20 = vld [vmem:[%s308_s2 + $0x60] sm:$0xff]  ;;  %v32_v21 = vld [vmem:[%s308_s2 + $0x68] sm:$0xff]  ;;  %v33_v23 = vld [vmem:[%s308_s2 + $0x70] sm:$0xff] }
   0x6   :  { %v208_v22 = vpack.c.bf16 %v32_v21, %v31_v20  ;;  %v34_v24 = vld [vmem:[%s308_s2 + $0x78] sm:$0xff]  ;;  %v17_v26 = vld [vmem:[%s309_s0] sm:$0xff] }
   0x7   :  { %v211_v25 = vpack.c.bf16 %v34_v24, %v33_v23  ;;  %v136_v29 = vld [vmem:[%s310_s3] ss:$0 sm:$0xff] }
   0x8   :  { %194 = vmatpush3.bf16.msra.mxu0 %v193_v7  ;;  %v18_v41 = vld [vmem:[%s311_s1] sm:$0xff] }
   0x9   :  { %195 = vmatprep.subr.bf16.mxu0 %v220_v0 }
   0xc   :  { %197 = vmatpush3.bf16.msra.mxu0 %v196_v10 }
   0xd   :  { %198 = vmatprep.subr.bf16.mxu0 %v220_v0 }
  0x10   :  { %200 = vmatpush3.bf16.msra.mxu0 %v199_v13 }
  0x11   :  { %201 = vmatprep.subr.bf16.mxu0 %v220_v0 }
  0x14   :  { %203 = vmatpush3.bf16.msra.mxu0 %v202_v16 }
  0x15   :  { %204 = vmatprep.subr.bf16.mxu0 %v220_v0 }
  0x18   :  { %206 = vmatpush3.bf16.msra.mxu0 %v205_v19 }
  0x19   :  { %207 = vmatprep.subr.bf16.mxu0 %v220_v0 }
  0x1c   :  { %209 = vmatpush3.bf16.msra.mxu0 %v208_v22 }
  0x1d   :  { %210 = vmatprep.subr.bf16.mxu0 %v220_v0 }
  0x20   :  { %212 = vmatpush3.bf16.msra.mxu0 %v211_v25 }
  0x23   :  { %187 = vmatmul.mubr.f32.vlgmr.msra.gmra.mrb[0].mxu0 %v17_v26 }
  0xf6   :  { %v108_v30 = vpop.f32.mrb[0].mxu0 }
  0xf7   :  { %v109_v31 = vadd.f32 %v136_v29, %v108_v30  ;;  %v188_v32 = vpop.f32.mrb[1].mxu0 }
  0xf9   :  { %v115_v33 = vsel %vm114_vm1, %v109_v31, 0.0 }
  0xfa   :  { %116 = vadd.xlane.f32.xlu0 %v115_v33 }
 0x187   :  { %v117_v34 = vpop.xlane.xlu0 %116 }
 0x188   :  { %v118_v35 = vrot.slane %v117_v34, 4 }
 0x18a   :  { %v119_v36 = vadd.f32 %v118_v35, %v117_v34 }
 0x18c   :  { %v120_v37 = vrot.slane %v119_v36, 2 }
 0x18e   :  { %v121_v38 = vadd.f32 %v120_v37, %v119_v36 }
 0x190   :  { %v122_v39 = vrot.slane %v121_v38, 1 }
 0x192   :  { %v123_v40 = vadd.f32 %v122_v39, %v121_v38 }
 0x194   :  { %213 = vpush %v123_v40 }
 0x1c5   :  { %s214_s0 = spop %213 }
 0x1c6   :  { %p125_p0 = scmp.gt.f32.partialorder %s214_s0, 0.0 }
 0x1c8   :  { %s126_s2 = scalar_select %p125_p0, 1.0, -1.0 }
 0x1ca   :  { %v127_v42 = vstv %s126_s2 }
 0x1cb   :  { %v128_v43 = vmul.f32 %v127_v42, %v109_v31 }
 0x1cd   :  { %v129_v44 = vadd.f32 %v128_v43, %v18_v41 }
 0x1cf   :  { %218 = vtanh.f32 %v129_v44 }
 0x1d9   :  { %v219_v45 = vpop.eup %218 }
 0x1da   :  { %131 = vst [vmem:[%s312_s4] sm:$0xff] %v219_v45 }

</bundles_post_ra>
